<compile_context>
chip_gen: v5e
topology: v5e:2x2
jax: 0.10.0
libtpu: 0.0.40
codegen_flags: <defaults>
</compile_context>

<pallas_src>
import math
import jax
import jax.numpy as jnp
from jax.experimental import pallas as pl
from jax.experimental.pallas import tpu as pltpu


def _round_up(x: int, m: int) -> int:
    return ((x + m - 1) // m) * m


def _cdiv(a: int, b: int) -> int:
    return (a + b - 1) // b


def _mlp_kernel(h_ref, w1_ref, b1_ref, w2_ref, b2_ref, o_ref):
    # matmul -> bias -> ReLU -> matmul -> bias, fully on-chip, f32 accumulation.
    h = h_ref[...]
    z = jnp.dot(h, w1_ref[...], preferred_element_type=jnp.float32)
    z = jnp.maximum(z + b1_ref[...], 0.0)
    y = jnp.dot(z.astype(w2_ref.dtype), w2_ref[...],
                preferred_element_type=jnp.float32)
    o_ref[...] = (y + b2_ref[...]).astype(o_ref.dtype)


def _vmem_budget_bytes() -> int:
    """Generation-aware VMEM budget: ~65% of physical, clamped to 32..100 MiB."""
    try:
        cap = int(pltpu.get_tpu_info().vmem_capacity_bytes)
    except Exception:
        cap = 64 << 20  # conservative fallback (v7x per-TensorCore physical VMEM)
    return max(32 << 20, min(int(0.65 * cap), 100 << 20))


def mlp_plain_forward(h, w1, b1, w2, b2, *, tm=2048, compute_dtype=None):
    """h: (..., h_size); w1: (h_size, emb); b1: (emb,) or (1, emb);
    w2: (emb, y_size); b2: (y_size,) or (1, y_size). Returns (..., y_size).

    compute_dtype: optional low-precision dtype (e.g. jnp.bfloat16) for
    h/w1/w2; accumulation and biases stay f32, output keeps h.dtype.
    """
    lead_shape = h.shape[:-1]
    K = h.shape[-1]          # h_size
    E = w1.shape[-1]         # embedding_size
    N = w2.shape[-1]         # y_size
    assert w1.shape[0] == K and w2.shape[0] == E

    out_dtype = h.dtype
    cdtype = jnp.dtype(compute_dtype) if compute_dtype is not None else jnp.dtype(h.dtype)

    h2d = h.reshape(-1, K).astype(cdtype)
    M = h2d.shape[0]

    w1c = jnp.asarray(w1, cdtype)
    w2c = jnp.asarray(w2, cdtype)
    b1f = jnp.asarray(b1, jnp.float32).reshape(1, E)
    b2f = jnp.asarray(b2, jnp.float32).reshape(1, N)

    c_isz = jnp.dtype(cdtype).itemsize
    o_isz = jnp.dtype(out_dtype).itemsize
    vmem_budget = _vmem_budget_bytes()

    def footprint(rows: int) -> int:
        act = 2 * rows * K * c_isz                 # double-buffered h tiles
        out = 2 * rows * N * o_isz                 # double-buffered out tiles
        mid = rows * E * 4 + rows * N * 4          # f32 intermediates
        wts = 2 * ((K * E + E * N) * c_isz + (E + N) * 4)  # resident weights (x2 bufs)
        return act + out + mid + wts

    # Balanced row tiling: residual pad is at most a few rows, not up to TM.
    M8 = _round_up(max(M, 1), 8)
    ntiles = max(1, _cdiv(M8, tm))
    if M8 >= 16:
        ntiles = max(ntiles, 2)    # >= 2 grid steps so both v7x cores get work
    TM = _round_up(_cdiv(M8, ntiles), 8)
    # Auto-shrink the tile if the pipeline footprint exceeds the VMEM budget.
    while TM > 8 and footprint(TM) > vmem_budget:
        TM = _round_up(_cdiv(TM, 2), 8)
    ntiles = _cdiv(M8, TM)
    Mp = ntiles * TM

    if Mp != M:
        h2d = jnp.pad(h2d, ((0, Mp - M), (0, 0)))   # small row pad only

    out = pl.pallas_call(
        _mlp_kernel,
        out_shape=jax.ShapeDtypeStruct((Mp, N), out_dtype),
        grid_spec=pltpu.PrefetchScalarGridSpec(
            num_scalar_prefetch=0,
            grid=(ntiles,),
            in_specs=[
                pl.BlockSpec((TM, K), lambda i: (i, 0)),  # h row tile (pipelined)
                pl.BlockSpec((K, E), lambda i: (0, 0)),   # w1 resident
                pl.BlockSpec((1, E), lambda i: (0, 0)),   # b1 resident (f32)
                pl.BlockSpec((E, N), lambda i: (0, 0)),   # w2 resident
                pl.BlockSpec((1, N), lambda i: (0, 0)),   # b2 resident (f32)
            ],
            out_specs=pl.BlockSpec((TM, N), lambda i: (i, 0)),
        ),
        compiler_params=pltpu.CompilerParams(
            dimension_semantics=("parallel",),
            vmem_limit_bytes=int(vmem_budget),
        ),
    )(h2d, w1c, b1f, w2c, b2f)

    if Mp != M:
        out = out[:M]
    return out.reshape(*lead_shape, N)


def init_mlp_plain_params(key, h_size, embedding_size, y_size, dtype=jnp.float32):
    """Xavier-uniform with gain = calculate_gain('relu') = sqrt(2), biases = 0
    (matches the PyTorch weight init)."""
    gain = math.sqrt(2.0)
    k1, k2 = jax.random.split(key)

    def xavier(k, fan_in, fan_out):
        a = gain * math.sqrt(6.0 / (fan_in + fan_out))
        # stored as (in, out): transpose of PyTorch's (out, in) weight layout
        return jax.random.uniform(k, (fan_in, fan_out), dtype=dtype, minval=-a, maxval=a)

    w1 = xavier(k1, h_size, embedding_size)
    b1 = jnp.zeros((1, embedding_size), dtype=dtype)
    w2 = xavier(k2, embedding_size, y_size)
    b2 = jnp.zeros((1, y_size), dtype=dtype)
    return w1, b1, w2, b2


if __name__ == "__main__":
    # small shapes consistent with the module: h is (batch, seq, h_size)
    batch, seq = 2, 8
    h_size, embedding_size, y_size = 32, 64, 16

    key = jax.random.PRNGKey(0)
    k_h, k_p = jax.random.split(key)

    h = jax.random.normal(k_h, (batch, seq, h_size), dtype=jnp.float32)
    w1, b1, w2, b2 = init_mlp_plain_params(k_p, h_size, embedding_size, y_size)

    # f32 path (exact match to the PyTorch forward semantics)
    y = mlp_plain_forward(h, w1, b1, w2, b2)
    y = jax.block_until_ready(y)

    ref = jnp.maximum(h.reshape(-1, h_size) @ w1 + b1, 0.0) @ w2 + b2
    ref = ref.reshape(batch, seq, y_size)
    assert y.shape == (batch, seq, y_size)
    assert jnp.allclose(y, ref, atol=1e-5, rtol=1e-5)

    # optional bf16 compute path (halves HBM bytes; f32 accumulation retained)
    y_bf16 = mlp_plain_forward(h, w1, b1, w2, b2, compute_dtype=jnp.bfloat16)
    y_bf16 = jax.block_until_ready(y_bf16)
    assert jnp.allclose(y_bf16, ref, atol=0.15, rtol=0.05)

    print("KERNEL_OK")
</pallas_src>

<mosaic_0001>
module attributes {stable_mosaic.version = 11 : i64} {
  func.func @_mlp_kernel(%arg0: i32, %arg1: memref<8x32xf32, #tpu.memory_space<vmem>>, %arg2: memref<32x64xf32, #tpu.memory_space<vmem>>, %arg3: memref<1x64xf32, #tpu.memory_space<vmem>>, %arg4: memref<64x16xf32, #tpu.memory_space<vmem>>, %arg5: memref<1x16xf32, #tpu.memory_space<vmem>>, %arg6: memref<8x16xf32, #tpu.memory_space<vmem>>) attributes {dimension_semantics = [#tpu.dimension_semantics<parallel>], iteration_bounds = array<i64: 2>, scalar_prefetch = 0 : i64, scratch_operands = 0 : i64, tpu.core_type = #tpu.core_type<tc>, window_params = [{transform_indices = @transform_0, window_bounds = array<i64: 8, 32>}, {pipeline_mode = #tpu.pipeline_mode<synchronous>, transform_indices = @transform_1, window_bounds = array<i64: 32, 64>}, {pipeline_mode = #tpu.pipeline_mode<synchronous>, transform_indices = @transform_2, window_bounds = array<i64: 1, 64>}, {pipeline_mode = #tpu.pipeline_mode<synchronous>, transform_indices = @transform_3, window_bounds = array<i64: 64, 16>}, {pipeline_mode = #tpu.pipeline_mode<synchronous>, transform_indices = @transform_4, window_bounds = array<i64: 1, 16>}, {transform_indices = @transform_5, window_bounds = array<i64: 8, 16>}]} {
    %c0 = arith.constant 0 : index
    %c0_0 = arith.constant 0 : index
    %0 = vector.load %arg1[%c0, %c0_0] : memref<8x32xf32, #tpu.memory_space<vmem>>, vector<8x32xf32>
    %c0_1 = arith.constant 0 : index
    %c0_2 = arith.constant 0 : index
    %1 = vector.load %arg2[%c0_1, %c0_2] : memref<32x64xf32, #tpu.memory_space<vmem>>, vector<32x64xf32>
    %cst = arith.constant dense<0.000000e+00> : vector<8x64xf32>
    %2 = tpu.matmul %0, %1, %cst {dimension_numbers = #tpu.dot_dimension_numbers<[1], [0], [0], [1], [0, 0, 1, 1], [], []>} : vector<8x32xf32>, vector<32x64xf32>, vector<8x64xf32> -> vector<8x64xf32>
    %c0_3 = arith.constant 0 : index
    %c0_4 = arith.constant 0 : index
    %3 = vector.load %arg3[%c0_3, %c0_4] : memref<1x64xf32, #tpu.memory_space<vmem>>, vector<1x64xf32>
    %4 = vector.broadcast %3 : vector<1x64xf32> to vector<8x64xf32>
    %5 = arith.addf %2, %4 : vector<8x64xf32>
    %cst_5 = arith.constant 0.000000e+00 : f32
    %6 = vector.broadcast %cst_5 : f32 to vector<8x64xf32>
    %7 = arith.maximumf %5, %6 : vector<8x64xf32>
    %c0_6 = arith.constant 0 : index
    %c0_7 = arith.constant 0 : index
    %8 = vector.load %arg4[%c0_6, %c0_7] : memref<64x16xf32, #tpu.memory_space<vmem>>, vector<64x16xf32>
    %cst_8 = arith.constant dense<0.000000e+00> : vector<8x16xf32>
    %9 = tpu.matmul %7, %8, %cst_8 {dimension_numbers = #tpu.dot_dimension_numbers<[1], [0], [0], [1], [0, 0, 1, 1], [], []>} : vector<8x64xf32>, vector<64x16xf32>, vector<8x16xf32> -> vector<8x16xf32>
    %c0_9 = arith.constant 0 : index
    %c0_10 = arith.constant 0 : index
    %10 = vector.load %arg5[%c0_9, %c0_10] : memref<1x16xf32, #tpu.memory_space<vmem>>, vector<1x16xf32>
    %11 = vector.broadcast %10 : vector<1x16xf32> to vector<8x16xf32>
    %12 = arith.addf %9, %11 : vector<8x16xf32>
    %c0_11 = arith.constant 0 : index
    %c0_12 = arith.constant 0 : index
    %13 = vector.load %arg6[%c0_11, %c0_12] : memref<8x16xf32, #tpu.memory_space<vmem>>, vector<8x16xf32>
    tpu.vector_store %arg6[%c0_11, %c0_12], %12 {strides = array<i32>} : memref<8x16xf32, #tpu.memory_space<vmem>>, vector<8x16xf32>,
    return
  }
  func.func @transform_0(%arg0: i32) -> (i32, i32) {
    %c0_i32 = arith.constant 0 : i32
    %c0_i32_0 = arith.constant 0 : i32
    return %arg0, %c0_i32 : i32, i32
  }
  func.func @transform_1(%arg0: i32) -> (i32, i32) {
    %c0_i32 = arith.constant 0 : i32
    %c0_i32_0 = arith.constant 0 : i32
    %c0_i32_1 = arith.constant 0 : i32
    return %c0_i32, %c0_i32_0 : i32, i32
  }
  func.func @transform_2(%arg0: i32) -> (i32, i32) {
    %c0_i32 = arith.constant 0 : i32
    %c0_i32_0 = arith.constant 0 : i32
    %c0_i32_1 = arith.constant 0 : i32
    return %c0_i32, %c0_i32_0 : i32, i32
  }
  func.func @transform_3(%arg0: i32) -> (i32, i32) {
    %c0_i32 = arith.constant 0 : i32
    %c0_i32_0 = arith.constant 0 : i32
    %c0_i32_1 = arith.constant 0 : i32
    return %c0_i32, %c0_i32_0 : i32, i32
  }
  func.func @transform_4(%arg0: i32) -> (i32, i32) {
    %c0_i32 = arith.constant 0 : i32
    %c0_i32_0 = arith.constant 0 : i32
    %c0_i32_1 = arith.constant 0 : i32
    return %c0_i32, %c0_i32_0 : i32, i32
  }
  func.func @transform_5(%arg0: i32) -> (i32, i32) {
    %c0_i32 = arith.constant 0 : i32
    %c0_i32_0 = arith.constant 0 : i32
    return %arg0, %c0_i32 : i32, i32
  }
}

</mosaic_0001>

<bundles_post_ra>
// kernel: tpu_custom_call.1
= control target key start
LH: loop header
LB: loop body
LE: loop exit
PB: predicated region body
PF: predicated region fallthrough
CT: control target
= control target key end

     0   :  { %10 = vsyncpa [#allocation3], 0  ;;  %s641_s0 = inlined_call_operand.vmem [shape: f32[16,32], index: 0, kind: input, shape index: {}]   ;;  %s642_s1 = inlined_call_operand.vmem [shape: f32[32,64], index: 1, kind: input, shape index: {}]   ;;  %s643_s2 = inlined_call_operand.vmem [shape: f32[1,64], index: 2, kind: input, shape index: {}]   ;;  %s644_s3 = inlined_call_operand.vmem [shape: f32[64,16], index: 3, kind: input, shape index: {}]   ;;  %s645_s4 = inlined_call_operand.vmem [shape: f32[1,16], index: 4, kind: input, shape index: {}]   ;;  %s646_s5 = inlined_call_operand.hbm [shape: f32[16,16], index: 5, kind: output, shape index: {}]  }
   0x1   :  { %12 = vsyncpa [#allocation3 + $0x1], 0  ;;  %s514_s18 = smov 0   ;;  %s516_s19 = smov 0  }
   0x2   :  { %s518_s20 = smov 0   ;;  %s520_s21 = smov 0  }
   0x3 LB: > { %s535_s22 = sadd.s32 4294967295, %s482_s21   ;;  %s367_s23 = sadd.s32 4294967294, %s482_s21   ;;  %s482_s21 = sphi %s520_s21, %s652_s21   ;;  %s478_s20 = sphi %s518_s20, %s651_s20   ;;  %s474_s19 = sphi %s516_s19, %s650_s19   ;;  %s470_s18 = sphi %s514_s18, %s649_s18  }
   0x4   : > { %s539_s24 = sadd.s32 1, %s482_s21   ;;  %s135_s25 = sadd.s32 1, %s478_s20 }
   0x5   : > { %s132_s26 = ssub.s32 %s482_s21, %s539_s24  ;;  %p145_p0 = scmp.ne.s32.totalorder %s478_s20, %s474_s19 }
   0x6   : > { %p133_p1 = scmp.eq.s32.totalorder %s132_s26, 0  ;;  %p146_p2 = scmp.eq.s32.totalorder %s535_s22, 1 }
   0x7   : > { %p151_p3 = scmp.ne.s32.totalorder %s474_s19, %s470_s18  ;;  %p152_p4 = scmp.eq.s32.totalorder %s367_s23, 1 }
   0x8   : > { %s550_s27 = scalar_select %p133_p1, %s478_s20, %s135_s25  }
   0x9   : > { %p552_p5 = por %p146_p2, %p145_p0  ;;  %p556_p6 = por %p152_p4, %p151_p3 }
   0xa   : > { %p370_p7 = scmp.ge.s32.totalorder %s482_s21, 1  ;;  %p189_p8 = scmp.lt.s32.totalorder %s482_s21, 3 }
   0xc   : > { %p190_p9 = pnand %p370_p7, %p189_p8 }
   0xd   : > { %p216_p10 = scmp.lt.s32.totalorder (!%p190_p9), %s535_s22, 1  ;;  %s376_s6 = sshll.u32 (!%p190_p9), %s535_s22, 3 }
   0xe   : > { %193 = sbr.rel (%p190_p9) target bundleno = 288 (0x120), region = 40  ;;  %s303_s9 = scalar_lea.hbm (!%p190_p9), %s646_s5, %s376_s6 }
   0xf   : > { %s307_s14 = sshll.u32 (!%p190_p9), %s303_s9, 4  ;;  %s440_s25 = scalar_lea.hbm (!%p190_p9), %s646_s5, 16  ;;  %s308_s14 = int_to_ptr.hbm [resolvable:$true] %s307_s14 }
  0x13   : > { %v224_v0 = vld [vmem:[%s642_s1 + $0x18] sm:$0xff]  ;;  %v223_v1 = vld [vmem:[%s642_s1 + $0x10] sm:$0xff]  ;;  %v222_v4 = vld [vmem:[%s642_s1 + $0x8] sm:$0xff]  ;;  %s217_s15 = scalar_select %p216_p10, %s535_s22, 1  ;;  %vm229_vm0 = vcmask 261120   ;;  %vm266_vm1 = vcmask 523264  }
  0x14   : > { %245 = vmatpush.msra.mxu0 %v224_v0  ;;  %v261_v2 = vld [vmem:[%s644_s3 + $0x38] sm:$0xff]  ;;  %v260_v3 = vld [vmem:[%s644_s3 + $0x30] sm:$0xff]  ;;  %v259_v5 = vld [vmem:[%s644_s3 + $0x28] sm:$0xff]  ;;  %vm290_vm2 = vcmask 130048   ;;  %s434_s22 = sshra.s32 %s308_s14, 4  ;;  %s435_s22 = int_to_ptr.hbm [resolvable:$true] %s434_s22 }
  0x15   : > { %278 = vmatpush.msra.mxu1 %v261_v2  ;;  %v221_v6 = vld [vmem:[%s642_s1] sm:$0xff]  ;;  %s372_s26 = sshll.u32 %s217_s15, 3  ;;  %v257_v9 = vld [vmem:[%s644_s3 + $0x18] sm:$0xff]  ;;  %v256_v10 = vld [vmem:[%s644_s3 + $0x10] sm:$0xff]  ;;  %s436_s16 = scalar_lea.hbm %s435_s22, 8 }
  0x16   : > { %246 = vmatpush.msra.mxu0 %v223_v1  ;;  %s219_s7 = scalar_lea.vmem %s641_s0, %s372_s26  ;;  %v258_v7 = vld [vmem:[%s644_s3 + $0x20] sm:$0xff]  ;;  %v255_v11 = vld [vmem:[%s644_s3 + $0x8] sm:$0xff]  ;;  %s213_s26 = sand.u32 1, %s474_s19  }
  0x17   : > { %279 = vmatpush.msra.mxu1 %v260_v3  ;;  %v220_v8 = vld [vmem:[%s219_s7] sm:$0xff]  ;;  %s371_s30 = sshll.u32 %s213_s26, 3  ;;  %s293_s15 = scalar_lea.sflag [#allocation3], %s213_s26 }
  0x18   : > { %247 = vmatpush.msra.mxu0 %v222_v4  ;;  %v254_v12 = vld [vmem:[%s644_s3] sm:$0xff]  ;;  %s215_s12 = scalar_lea.vmem [#allocation2], %s371_s30  ;;  %p437_p11 = scmp.ne.s32.totalorder %s435_s22, %s436_s16 }
  0x19   : > { %280 = vmatpush.msra.mxu1 %v259_v5  ;;  %v418_v13 = vld [vmem:[%s643_s2] ss:$0 sm:$0xff]  ;;  %s305_s13 = sshll.u32 %s215_s12, 4  ;;  %p441_p0 = scmp.lt.s32.totalorder %s435_s22, %s646_s5  ;;  %s306_s13 = int_to_ptr.vmem [resolvable:$true] %s305_s13 }
  0x1a   : > { %248 = vmatpush.msra.mxu0 %v221_v6  ;;  %v419_v17 = vld [vmem:[%s645_s4] ss:$0 sm:$0xff]  ;;  %p438_p12 = pnand %p437_p11, %p552_p5  ;;  %p442_p1 = scmp.lt.s32.totalorder %s440_s25, %s436_s16 }
  0x1b   : > { %373 = vmatmul.msk.f32.vlgmr.msra.gmra.mxu0 %vm229_vm0, %v220_v8  ;;  %281 = vmatpush.msra.mxu1 %v258_v7 }
  0x1c   : > { %p439_p13 = pneg %p438_p12  ;;  %p443_p2 = por %p442_p1, %p441_p0 }
  0x1d   : > { %282 = vmatpush.msra.mxu1 %v257_v9 }
  0x1e   : > { %p444_p3 = pnand %p443_p2, %p439_p13 }
  0x1f   : > { %283 = vmatpush.msra.mxu1 %v256_v10 }
  0x21   : > { %284 = vmatpush.msra.mxu1 %v255_v11 }
  0x23   : > { %285 = vmatpush.msra.mxu1 %v254_v12 }
  0x98   : > { %v250_v14 = vpop.f32.mrf.mxu0 }
  0x99   : > { %v251_v15 = vadd.f32 %v418_v13, %v250_v14 }
  0x9b   : > { %v253_v16 = vmax.f32 %v251_v15, 0.0 }
  0x9d   : > { %374 = vmatmul.msk.f32.vlgmr.msra.gmra.mxu1 %vm266_vm1, %v253_v16 }
 0x11a   : > { %v287_v18 = vpop.f32.mrf.mxu1 }
 0x11b   : > { %v288_v19 = vadd.f32 %v419_v17, %v287_v18 }
 0x11d   : > { %291 = vst.msk [vmem:[%s215_s12] sm:$0xff] %vm290_vm2, %v288_v19 }
 0x11e   : > { %447 = shalt.err (!%p444_p3)
}
 0x11f   : > { %379 = dma.vmem_to_hbm [thread:$0]  (%p552_p5), %s306_s13, 128, %s308_s14, %s293_s15  }
 0x120 PF: > { %p385_p4 = scmp.ge.s32.totalorder %s482_s21, 2  ;;  %s319_s26 = sand.u32 1, %s470_s18  }
 0x121   : > { %s320_s7 = scalar_lea.sflag [#allocation3], %s319_s26 }
 0x122   : > { %p382_p7 = pnand %p385_p4, %p556_p6 }
 0x124   : > { %p383_p8 = pneg %p382_p7 }
 0x126   : > { %465 = dma.done.wait (%p383_p8), %s320_s7, 128  }
 0x127   : > { %467 = vsyncadd (%p383_p8), %s320_s7, 4294967168  ;;  %p15_p9 = scmp.ge.s32.totalorder %s539_s24, 4   ;;  %s649_s18 = smov %s474_s19 }
 0x128   : > { %s650_s19 = smov %s478_s20  ;;  %s651_s20 = smov %s550_s27 }
 0x129   : > { %s652_s21 = smov %s539_s24  ;;  %17 = sbr.rel (!%p15_p9) target bundleno = 3 (0x3), region = 75 }
 0x12e   :  { %326 = vsyncpa [#allocation3], 1 }
 0x12f   :  { %328 = vsyncpa [#allocation3 + $0x1], 1 }

</bundles_post_ra>
